<compile_context>
chip_gen: v7x
topology: tpu7x:2x2x1
jax: 0.10.0
libtpu: 0.0.40
codegen_flags: <defaults>
</compile_context>

<pallas_src>
import jax
import jax.numpy as jnp
from jax.experimental import pallas as pl
from jax.experimental.pallas import tpu as pltpu


def mha_kernel(x_ref, wqkv_ref, wproj_ref, bproj_ref, o_ref, acc_ref):
    # x_ref:    (Bblk, T, C)
    # wqkv_ref: (1, C, 3H)   current head's fused [q|k|v] weight (scale in q)
    # wproj_ref:(1, H, C)    current head's slice of the output projection
    # bproj_ref:(1, C)
    # o_ref:    (Bblk, T, C)
    # acc_ref:  VMEM scratch (Bblk*T, C) f32, resident across the head axis
    h = pl.program_id(1)
    n_heads = pl.num_programs(1)

    Bblk, T, C = x_ref.shape
    H = wproj_ref.shape[1]
    dt = x_ref.dtype

    @pl.when(h == 0)
    def _():
        acc_ref[...] = jnp.zeros_like(acc_ref)

    x2 = x_ref[...].reshape(Bblk * T, C)                               # (M, C)

    # Per-head fused QKV projection (one MXU push); cast to compute dtype once,
    # then slice q/k/v statically (no dynamic lane slices, no per-slice casts).
    qkv = jnp.dot(x2, wqkv_ref[0],
                  preferred_element_type=jnp.float32).astype(dt)       # (M, 3H)
    q = qkv[:, 0 * H:1 * H].reshape(Bblk, T, H)
    k = qkv[:, 1 * H:2 * H].reshape(Bblk, T, H)
    v = qkv[:, 2 * H:3 * H].reshape(Bblk, T, H)

    # Causal mask (cheap iota compare, shared by all rows of the block).
    row = jax.lax.broadcasted_iota(jnp.int32, (T, T), 0)
    col = jax.lax.broadcasted_iota(jnp.int32, (T, T), 1)
    causal = (col <= row)[None]                                        # (1, T, T)

    # Scores: head-dim contraction of q and k (no explicit transpose); the
    # 1/sqrt(H) scale is already folded into the q weight columns.
    s = jnp.einsum('bqd,bkd->bqk', q, k,
                   preferred_element_type=jnp.float32)                 # (Bblk, T, T)
    s = jnp.where(causal, s, -jnp.inf)

    # Numerically stable softmax in f32; exact reciprocal (training-quality),
    # folded into the attention epilogue instead of a (T, T) normalize.
    m = jnp.max(s, axis=-1, keepdims=True)
    p = jnp.exp(s - m)
    denom = jnp.sum(p, axis=-1, keepdims=True)
    inv = pl.reciprocal(denom, approx=False)                           # (Bblk, T, 1)

    ctx = jnp.einsum('bqk,bkd->bqd', p.astype(dt), v,
                     preferred_element_type=jnp.float32)               # (Bblk, T, H)
    ctx = (ctx * inv).astype(dt).reshape(Bblk * T, H)

    # Accumulate this head's contribution to the output projection.
    acc_ref[...] += jnp.dot(ctx, wproj_ref[0],
                            preferred_element_type=jnp.float32)        # (M, C)

    @pl.when(h == n_heads - 1)
    def _():
        out = acc_ref[...] + bproj_ref[...].astype(jnp.float32)        # + bias
        o_ref[...] = out.reshape(Bblk, T, C).astype(o_ref.dtype)       # lane-dense store


def prepare_mha_weights(wq, wk, wv, w_proj, b_proj):
    """Host-side, once per model (not per forward): fuse per-head [q|k|v]
    weights (folding the 1/sqrt(H) scale into q) and reshape the output
    projection so the kernel only DMAs per-head slices."""
    nH, C, H = wq.shape
    scale = float(H) ** -0.5
    w_qkv = jnp.concatenate([wq * scale, wk, wv], axis=-1)             # (nH, C, 3H)
    w_proj_h = w_proj.reshape(nH, H, C)                                # (nH, H, C)
    b2 = b_proj.reshape(1, C)                                          # (1, C)
    return w_qkv, w_proj_h, b2


def mha_forward_prepared(x, w_qkv, w_proj_h, b2, *, batch_block=None):
    B, T, C = x.shape
    nH, C_in, H3 = w_qkv.shape
    H = H3 // 3
    D = nH * H
    assert C_in == C and w_proj_h.shape == (nH, H, C) and b2.shape == (1, C)

    # --- batch_block heuristic: M = batch_block*T near 256 rows (MXU-friendly
    # on v6e/v7x, >=128 on v5e) while keeping >= 2 grid steps on the parallel
    # batch axis when B allows it (v7x megacore + pipeline steady state).
    if batch_block is None:
        batch_block = max(1, min(B, 256 // max(T, 1)))
        while batch_block > 1 and B // batch_block < 2:
            batch_block = (batch_block + 1) // 2
    while B % batch_block:
        batch_block -= 1
    n_blocks = B // batch_block
    M = batch_block * T
    itemsize = jnp.dtype(x.dtype).itemsize

    # --- explicit VMEM budget (re-derived for v7x's 64 MiB/TC; also covers the
    # 16/32 MiB default scoped limits on v5e/v6e).
    est = (
        2 * M * C * itemsize                       # x block (double-buffered)
        + 2 * M * C * itemsize                     # out block
        + M * C * 4                                # f32 accumulator scratch
        + 2 * (C * 3 * H + H * C + C) * itemsize   # per-head weight slices (x2 bufs)
        + M * 3 * H * (4 + itemsize)               # qkv f32 result + compute-dtype copy
        + 2 * batch_block * T * T * 4              # scores + exp(p)
        + M * H * 4                                # per-head context
    )
    vmem_limit = int(min(max(4 * est, 16 << 20), 48 << 20))

    # --- advisory cost estimate so XLA schedules surrounding ops sensibly.
    flops = 2 * B * T * C * 3 * D + 4 * B * nH * T * T * H + 2 * B * T * D * C
    transcendentals = B * nH * T * T
    bytes_accessed = (2 * B * T * C + n_blocks * (C * 3 * D + D * C + C)) * itemsize

    return pl.pallas_call(
        mha_kernel,
        out_shape=jax.ShapeDtypeStruct((B, T, C), x.dtype),
        grid_spec=pltpu.PrefetchScalarGridSpec(
            num_scalar_prefetch=0,
            grid=(n_blocks, nH),
            in_specs=[
                # x block: index map ignores h -> stays resident across heads.
                pl.BlockSpec((batch_block, T, C), lambda i, h: (i, 0, 0)),
                # Per-head weight slices: change every step -> pipeline prefetches
                # the next head's slice while the current head computes.
                pl.BlockSpec((1, C, 3 * H), lambda i, h: (h, 0, 0)),
                pl.BlockSpec((1, H, C), lambda i, h: (h, 0, 0)),
                pl.BlockSpec((1, C), lambda i, h: (0, 0)),
            ],
            out_specs=pl.BlockSpec((batch_block, T, C), lambda i, h: (i, 0, 0)),
            scratch_shapes=[pltpu.VMEM((M, C), jnp.float32)],
        ),
        compiler_params=pltpu.CompilerParams(
            dimension_semantics=("parallel", "arbitrary"),
            vmem_limit_bytes=vmem_limit),
        cost_estimate=pl.CostEstimate(
            flops=flops,
            transcendentals=transcendentals,
            bytes_accessed=bytes_accessed),
    )(x, w_qkv, w_proj_h, b2)


def mha_forward(x, wq, wk, wv, w_proj, b_proj, *, batch_block=None):
    """x: (B,T,C); wq/wk/wv: (nH,C,H); w_proj: (nH*H,C); b_proj: (C,) -> (B,T,C)."""
    w_qkv, w_proj_h, b2 = prepare_mha_weights(wq, wk, wv, w_proj, b_proj)
    return mha_forward_prepared(x, w_qkv, w_proj_h, b2, batch_block=batch_block)


def mha_reference(x, wq, wk, wv, w_proj, b_proj):
    """Pure-JAX reference matching the PyTorch MultiHeadAttention exactly."""
    B, T, C = x.shape
    nH = wq.shape[0]
    tril = jnp.tril(jnp.ones((T, T), dtype=bool))
    outs = []
    for h in range(nH):
        k = x @ wk[h]
        q = x @ wq[h]
        v = x @ wv[h]
        wei = (q @ jnp.swapaxes(k, -2, -1)) * (k.shape[-1] ** -0.5)
        wei = jnp.where(tril, wei, -jnp.inf)
        wei = jax.nn.softmax(wei, axis=-1)
        outs.append(wei @ v)
    cat = jnp.concatenate(outs, axis=-1)
    return cat @ w_proj + b_proj


if __name__ == "__main__":
    # batch=2, seq=8, embed=32, num_heads=2, head_size=16 (num_heads*head_size == embed).
    B, T, C = 2, 8, 32
    nH, H = 2, 16

    key = jax.random.PRNGKey(0)
    kx, kq, kk, kv, kp, kb = jax.random.split(key, 6)
    x = jax.random.normal(kx, (B, T, C), dtype=jnp.float32)
    wq = jax.random.normal(kq, (nH, C, H), dtype=jnp.float32) * (C ** -0.5)
    wk = jax.random.normal(kk, (nH, C, H), dtype=jnp.float32) * (C ** -0.5)
    wv = jax.random.normal(kv, (nH, C, H), dtype=jnp.float32) * (C ** -0.5)
    w_proj = jax.random.normal(kp, (nH * H, C), dtype=jnp.float32) * ((nH * H) ** -0.5)
    b_proj = jax.random.normal(kb, (C,), dtype=jnp.float32) * 0.01

    # Weight fusion is hoisted out of the per-call path (done once here).
    w_qkv, w_proj_h, b2 = prepare_mha_weights(wq, wk, wv, w_proj, b_proj)
    out = jax.block_until_ready(mha_forward_prepared(x, w_qkv, w_proj_h, b2))
    ref = mha_reference(x, wq, wk, wv, w_proj, b_proj)

    assert out.shape == ref.shape == (B, T, C), out.shape
    max_err = float(jnp.max(jnp.abs(out - ref)))
    assert jnp.allclose(out, ref, atol=1e-3, rtol=1e-3), max_err
    print("KERNEL_OK")
</pallas_src>

<mosaic_0001>
module attributes {stable_mosaic.version = 11 : i64} {
  func.func @mha_kernel(%arg0: i32, %arg1: i32, %arg2: memref<1x8x32xf32, #tpu.memory_space<vmem>>, %arg3: memref<1x32x48xf32, #tpu.memory_space<vmem>>, %arg4: memref<1x16x32xf32, #tpu.memory_space<vmem>>, %arg5: memref<1x32xf32, #tpu.memory_space<vmem>>, %arg6: memref<1x8x32xf32, #tpu.memory_space<vmem>>, %arg7: memref<8x32xf32, #tpu.memory_space<vmem>>) attributes {dimension_semantics = [#tpu.dimension_semantics<parallel>, #tpu.dimension_semantics<arbitrary>], iteration_bounds = array<i64: 2, 2>, scalar_prefetch = 0 : i64, scratch_operands = 1 : i64, tpu.core_type = #tpu.core_type<tc>, window_params = [{transform_indices = @transform_0, window_bounds = array<i64: 1, 8, 32>}, {transform_indices = @transform_1, window_bounds = array<i64: 1, 32, 48>}, {transform_indices = @transform_2, window_bounds = array<i64: 1, 16, 32>}, {pipeline_mode = #tpu.pipeline_mode<synchronous>, transform_indices = @transform_3, window_bounds = array<i64: 1, 32>}, {transform_indices = @transform_4, window_bounds = array<i64: 1, 8, 32>}]} {
    %c0_i32 = arith.constant 0 : i32
    %0 = arith.cmpi eq, %arg1, %c0_i32 : i32
    %1 = arith.extui %0 : i1 to i32
    %c0_i32_0 = arith.constant 0 : i32
    %2 = arith.cmpi ne, %1, %c0_i32_0 : i32
    scf.if %2 {
      %cst_20 = arith.constant 0.000000e+00 : f32
      %42 = vector.broadcast %cst_20 : f32 to vector<8x32xf32>
      %c0_21 = arith.constant 0 : index
      %c0_22 = arith.constant 0 : index
      %43 = vector.load %arg7[%c0_21, %c0_22] : memref<8x32xf32, #tpu.memory_space<vmem>>, vector<8x32xf32>
      tpu.vector_store %arg7[%c0_21, %c0_22], %42 {strides = array<i32>} : memref<8x32xf32, #tpu.memory_space<vmem>>, vector<8x32xf32>,
    } else {
    }
    %c0 = arith.constant 0 : index
    %c0_1 = arith.constant 0 : index
    %c0_2 = arith.constant 0 : index
    %3 = vector.load %arg2[%c0, %c0_1, %c0_2] : memref<1x8x32xf32, #tpu.memory_space<vmem>>, vector<1x8x32xf32>
    %4 = vector.shape_cast %3 : vector<1x8x32xf32> to vector<8x32xf32>
    %c0_3 = arith.constant 0 : index
    %c0_4 = arith.constant 0 : index
    %c0_5 = arith.constant 0 : index
    %5 = vector.load %arg3[%c0_3, %c0_4, %c0_5] : memref<1x32x48xf32, #tpu.memory_space<vmem>>, vector<1x32x48xf32>
    %6 = vector.shape_cast %5 : vector<1x32x48xf32> to vector<32x48xf32>
    %cst = arith.constant dense<0.000000e+00> : vector<8x48xf32>
    %7 = tpu.matmul %4, %6, %cst {dimension_numbers = #tpu.dot_dimension_numbers<[1], [0], [0], [1], [0, 0, 1, 1], [], []>} : vector<8x32xf32>, vector<32x48xf32>, vector<8x48xf32> -> vector<8x48xf32>
    %8 = vector.extract_strided_slice %7 {offsets = [0, 0], sizes = [8, 16], strides = [1, 1]} : vector<8x48xf32> to vector<8x16xf32>
    %9 = vector.shape_cast %8 : vector<8x16xf32> to vector<1x8x16xf32>
    %10 = vector.extract_strided_slice %7 {offsets = [0, 16], sizes = [8, 16], strides = [1, 1]} : vector<8x48xf32> to vector<8x16xf32>
    %11 = vector.shape_cast %10 : vector<8x16xf32> to vector<1x8x16xf32>
    %12 = vector.extract_strided_slice %7 {offsets = [0, 32], sizes = [8, 16], strides = [1, 1]} : vector<8x48xf32> to vector<8x16xf32>
    %13 = vector.shape_cast %12 : vector<8x16xf32> to vector<1x8x16xf32>
    %14 = tpu.iota {dimensions = array<i32: 0>} : vector<8x8xi32>
    %15 = tpu.iota {dimensions = array<i32: 1>} : vector<8x8xi32>
    %16 = arith.cmpi sle, %15, %14 : vector<8x8xi32>
    %17 = vector.shape_cast %16 : vector<8x8xi1> to vector<1x8x8xi1>
    "tpu.trace_start"() <{level = 10 : i32, message = "bqd,bkd->bqk"}> : () -> ()
    %cst_6 = arith.constant dense<0.000000e+00> : vector<1x8x8xf32>
    %18 = tpu.matmul %9, %11, %cst_6 {dimension_numbers = #tpu.dot_dimension_numbers<[2], [2], [1], [1], [0, 0, 0, 1, 1, 1], [0], [0]>} : vector<1x8x16xf32>, vector<1x8x16xf32>, vector<1x8x8xf32> -> vector<1x8x8xf32>
    %cst_7 = arith.constant 0xFF800000 : f32
    "tpu.trace_stop"() : () -> ()
    %19 = vector.broadcast %cst_7 : f32 to vector<1x8x8xf32>
    %20 = arith.select %17, %18, %19 : vector<1x8x8xi1>, vector<1x8x8xf32>
    %cst_8 = arith.constant dense<0xFF800000> : vector<1x8xf32>
    %21 = vector.multi_reduction <maximumf>, %20, %cst_8 [2] : vector<1x8x8xf32> to vector<1x8xf32>
    %22 = vector.shape_cast %21 : vector<1x8xf32> to vector<1x8x1xf32>
    %23 = vector.broadcast %22 : vector<1x8x1xf32> to vector<1x8x8xf32>
    %24 = arith.subf %20, %23 : vector<1x8x8xf32>
    %25 = math.exp %24 : vector<1x8x8xf32>
    %cst_9 = arith.constant dense<0.000000e+00> : vector<1x8xf32>
    %26 = vector.multi_reduction <add>, %25, %cst_9 [2] : vector<1x8x8xf32> to vector<1x8xf32>
    %27 = vector.shape_cast %26 : vector<1x8xf32> to vector<1x8x1xf32>
    %28 = tpu.reciprocal %27 : vector<1x8x1xf32> -> vector<1x8x1xf32>
    "tpu.trace_start"() <{level = 10 : i32, message = "bqk,bkd->bqd"}> : () -> ()
    %cst_10 = arith.constant dense<0.000000e+00> : vector<1x8x16xf32>
    %29 = tpu.matmul %25, %13, %cst_10 {dimension_numbers = #tpu.dot_dimension_numbers<[2], [1], [1], [2], [0, 0, 0, 1, 1, 2], [0], [0]>} : vector<1x8x8xf32>, vector<1x8x16xf32>, vector<1x8x16xf32> -> vector<1x8x16xf32>
    "tpu.trace_stop"() : () -> ()
    %30 = vector.broadcast %28 : vector<1x8x1xf32> to vector<1x8x16xf32>
    %31 = arith.mulf %29, %30 : vector<1x8x16xf32>
    %32 = vector.shape_cast %31 : vector<1x8x16xf32> to vector<8x16xf32>
    %c0_11 = arith.constant 0 : index
    %c0_12 = arith.constant 0 : index
    %33 = vector.load %arg7[%c0_11, %c0_12] : memref<8x32xf32, #tpu.memory_space<vmem>>, vector<8x32xf32>
    %c0_13 = arith.constant 0 : index
    %c0_14 = arith.constant 0 : index
    %c0_15 = arith.constant 0 : index
    %34 = vector.load %arg4[%c0_13, %c0_14, %c0_15] : memref<1x16x32xf32, #tpu.memory_space<vmem>>, vector<1x16x32xf32>
    %35 = vector.shape_cast %34 : vector<1x16x32xf32> to vector<16x32xf32>
    %cst_16 = arith.constant dense<0.000000e+00> : vector<8x32xf32>
    %36 = tpu.matmul %32, %35, %cst_16 {dimension_numbers = #tpu.dot_dimension_numbers<[1], [0], [0], [1], [0, 0, 1, 1], [], []>} : vector<8x16xf32>, vector<16x32xf32>, vector<8x32xf32> -> vector<8x32xf32>
    %37 = arith.addf %33, %36 : vector<8x32xf32>
    %c0_17 = arith.constant 0 : index
    %c0_18 = arith.constant 0 : index
    %38 = vector.load %arg7[%c0_17, %c0_18] : memref<8x32xf32, #tpu.memory_space<vmem>>, vector<8x32xf32>
    tpu.vector_store %arg7[%c0_17, %c0_18], %37 {strides = array<i32>} : memref<8x32xf32, #tpu.memory_space<vmem>>, vector<8x32xf32>,
    %c1_i32 = arith.constant 1 : i32
    %39 = arith.cmpi eq, %arg1, %c1_i32 : i32
    %40 = arith.extui %39 : i1 to i32
    %c0_i32_19 = arith.constant 0 : i32
    %41 = arith.cmpi ne, %40, %c0_i32_19 : i32
    scf.if %41 {
      %c0_20 = arith.constant 0 : index
      %c0_21 = arith.constant 0 : index
      %42 = vector.load %arg7[%c0_20, %c0_21] : memref<8x32xf32, #tpu.memory_space<vmem>>, vector<8x32xf32>
      %c0_22 = arith.constant 0 : index
      %c0_23 = arith.constant 0 : index
      %43 = vector.load %arg5[%c0_22, %c0_23] : memref<1x32xf32, #tpu.memory_space<vmem>>, vector<1x32xf32>
      %44 = vector.broadcast %43 : vector<1x32xf32> to vector<8x32xf32>
      %45 = arith.addf %42, %44 : vector<8x32xf32>
      %46 = vector.shape_cast %45 : vector<8x32xf32> to vector<1x8x32xf32>
      %c0_24 = arith.constant 0 : index
      %c0_25 = arith.constant 0 : index
      %c0_26 = arith.constant 0 : index
      %47 = vector.load %arg6[%c0_24, %c0_25, %c0_26] : memref<1x8x32xf32, #tpu.memory_space<vmem>>, vector<1x8x32xf32>
      tpu.vector_store %arg6[%c0_24, %c0_25, %c0_26], %46 {strides = array<i32>} : memref<1x8x32xf32, #tpu.memory_space<vmem>>, vector<1x8x32xf32>,
    } else {
    }
    return
  }
  func.func @transform_0(%arg0: i32, %arg1: i32) -> (i32, i32, i32) {
    %c0_i32 = arith.constant 0 : i32
    %c0_i32_0 = arith.constant 0 : i32
    %c0_i32_1 = arith.constant 0 : i32
    return %arg0, %c0_i32, %c0_i32_0 : i32, i32, i32
  }
  func.func @transform_1(%arg0: i32, %arg1: i32) -> (i32, i32, i32) {
    %c0_i32 = arith.constant 0 : i32
    %c0_i32_0 = arith.constant 0 : i32
    %c0_i32_1 = arith.constant 0 : i32
    return %arg1, %c0_i32, %c0_i32_0 : i32, i32, i32
  }
  func.func @transform_2(%arg0: i32, %arg1: i32) -> (i32, i32, i32) {
    %c0_i32 = arith.constant 0 : i32
    %c0_i32_0 = arith.constant 0 : i32
    %c0_i32_1 = arith.constant 0 : i32
    return %arg1, %c0_i32, %c0_i32_0 : i32, i32, i32
  }
  func.func @transform_3(%arg0: i32, %arg1: i32) -> (i32, i32) {
    %c0_i32 = arith.constant 0 : i32
    %c0_i32_0 = arith.constant 0 : i32
    %c0_i32_1 = arith.constant 0 : i32
    return %c0_i32, %c0_i32_0 : i32, i32
  }
  func.func @transform_4(%arg0: i32, %arg1: i32) -> (i32, i32, i32) {
    %c0_i32 = arith.constant 0 : i32
    %c0_i32_0 = arith.constant 0 : i32
    %c0_i32_1 = arith.constant 0 : i32
    return %arg0, %c0_i32, %c0_i32_0 : i32, i32, i32
  }
}

</mosaic_0001>

<bundles_post_ra>
// kernel: tpu_custom_call.1
= control target key start
LH: loop header
LB: loop body
LE: loop exit
PB: predicated region body
PF: predicated region fallthrough
CT: control target
= control target key end

     0   :  { %s1628_s0 = inlined_call_operand.hbm [shape: f32[2,8,32], index: 0, kind: input, shape index: {}]   ;;  %s1629_s1 = inlined_call_operand.hbm [shape: f32[2,32,48], index: 1, kind: input, shape index: {}]   ;;  %s1630_s2 = inlined_call_operand.hbm [shape: f32[2,16,32], index: 2, kind: input, shape index: {}]   ;;  %s1631_s3 = inlined_call_operand.vmem [shape: f32[1,32], index: 3, kind: input, shape index: {}]   ;;  %s1632_s4 = inlined_call_operand.hbm [shape: f32[2,8,32], index: 4, kind: output, shape index: {}]  }
   0x1   :  { %1646 = sst [smem:[#allocation21_spill]] %s1629_s1 }
   0x2   :  { %1647 = sst [smem:[#allocation22_spill]] %s1631_s3 }
   0x3   :  { %1648 = sst [smem:[#allocation23_spill]] %s1632_s4 }
   0x4   :  { %9 = vsyncpa [#allocation4], 0 }
   0x5   :  { %11 = vsyncpa [#allocation4 + $0x1], 0 }
   0x6   :  { %12 = vsyncpa [#allocation7], 0 }
   0x7   :  { %14 = vsyncpa [#allocation7 + $0x1], 0 }
   0x8   :  { %15 = vsyncpa [#allocation5], 0 }
   0x9   :  { %17 = vsyncpa [#allocation5 + $0x1], 0  ;;  %s1248_s15 = smov 0   ;;  %s1250_s16 = smov 0  }
   0xa   :  { %s1252_s17 = smov 0   ;;  %s1254_s18 = smov 0  }
   0xb   :  { %s1256_s19 = smov 0   ;;  %s1258_s20 = smov 0  }
   0xc   :  { %s1260_s21 = smov 0   ;;  %s1262_s22 = smov 0  }
   0xd   :  { %s1264_s23 = smov 0   ;;  %s1266_s24 = smov 0  }
   0xe   :  { %s1268_s25 = smov 0  }
   0xf LB: > { %1649 = sst [smem:[#allocation13_spill]] %s1177_s17  ;;  %s32_s26 = sadd.s32 1, %s1201_s23  ;;  %s1209_s25 = sphi %s1268_s25, %s23_s25   ;;  %s1205_s24 = sphi %s1266_s24, %s1686_s24   ;;  %s1201_s23 = sphi %s1264_s23, %s1692_s23   ;;  %s1197_s22 = sphi %s1262_s22, %s1684_s22   ;;  %s1193_s21 = sphi %s1260_s21, %s1691_s21   ;;  %s1189_s20 = sphi %s1258_s20, %s1683_s20   ;;  %s1185_s19 = sphi %s1256_s19, %s1690_s19   ;;  %s1181_s18 = sphi %s1254_s18, %s1689_s18   ;;  %s1177_s17 = sphi %s1252_s17, %s1681_s17   ;;  %s1173_s16 = sphi %s1250_s16, %s1688_s16   ;;  %s1169_s15 = sphi %s1248_s15, %s1687_s15  }
  0x10   : > { %1650 = sst [smem:[#allocation14_spill]] %s1189_s20  ;;  %p50_p0 = scmp.eq.s32.totalorder %s1209_s25, 0 }
  0x11   : > { %1651 = sst [smem:[#allocation15_spill]] %s1197_s22  ;;  %s68_s27 = sadd.s32 1, %s1177_s17 }
  0x12   : > { %1652 = sst [smem:[#allocation16_spill]] %s1205_s24  ;;  %p75_p1 = scmp.ne.s32.totalorder %s1177_s17, %s1173_s16 }
  0x13   : > { %p1633_p4 = scmp.lt.s32.totalorder %s1209_s25, 4  ;;  %s199_s28 = sand.u32 1, %s1209_s25  }
  0x14   : > { %p77_p3 = por %p75_p1, %p50_p0  ;;  %s201_s29 = sand.u32 1, %s1177_s17  }
  0x15   : > { %s795_s30 = sshll.u32 %s201_s29, 5  ;;  %s818_s5 = sshll.u32 %s1201_s23, 9 }
  0x16   : > { %s1653_s1 = sld [smem:[#allocation21_spill]]  ;;  %s203_s9 = scalar_lea.vmem [#allocation6], %s795_s30 }
  0x17   : > { %s210_s10 = sshll.u32 %s203_s9, 4  ;;  %p1325_p5 = pnand %p1633_p4, %p77_p3  ;;  %s1321_s10 = int_to_ptr.vmem [resolvable:$true] %s210_s10 }
  0x18   : > { %s1329_s12 = sshll.u32 %s201_s29, 4  ;;  %s1331_s13 = scalar_lea.sflag [#allocation7], %s199_s28 }
  0x19   : > { %p1638_p7 = pneg %p1325_p5 }
  0x1c   : > { %s1319_s8 = scalar_lea.hbm %s1653_s1, %s818_s5  ;;  %s998_s6 = scalar_lea.hbm %s1653_s1, 1024 }
  0x1d   : > { %s993_s14 = scalar_lea.hbm %s1319_s8, 512  ;;  %p999_p10 = scmp.lt.u32.totalorder %s1319_s8, %s1653_s1 }
  0x1e   : > { %p994_p6 = scmp.ne.s32.totalorder %s1319_s8, %s993_s14  ;;  %p1000_p11 = scmp.lt.u32.totalorder %s998_s6, %s993_s14 }
  0x1f   : > { %p1002_p13 = scmp.lt.u32.totalorder %s993_s14, %s1319_s8 }
  0x20   : > { %p996_p8 = pnand %p1638_p7, %p994_p6  ;;  %p1001_p12 = por %p1000_p11, %p999_p10 }
  0x22   : > { %p997_p9 = pneg %p996_p8  ;;  %p1003_p1 = por %p1002_p13, %p1001_p12 }
  0x24   : > { %p1004_p3 = pnand %p1003_p1, %p997_p9 }
  0x26   : > { %1007 = shalt.err (!%p1004_p3)
}
  0x27   : > { %s1008_s28 = scalar_lea.vmem %s1321_s10, 512  ;;  %s1211_s29 = smov [#allocation6]  }
  0x28   : > { %p1009_p6 = scmp.ne.s32.totalorder %s1321_s10, %s1008_s28  ;;  %s1013_s30 = sshll.u32 %s1211_s29, 4  ;;  %s1014_s30 = int_to_ptr.vmem [resolvable:$false] %s1013_s30 }
  0x29   : > { %s1015_s5 = scalar_lea.vmem %s1014_s30, 1024  ;;  %p1016_p2 = scmp.lt.s32.totalorder %s1321_s10, %s1014_s30 }
  0x2a   : > { %p1011_p8 = pnand %p1009_p6, %p1638_p7  ;;  %p1017_p10 = scmp.lt.s32.totalorder %s1015_s5, %s1008_s28 }
  0x2c   : > { %p1012_p4 = pneg %p1011_p8  ;;  %p1018_p11 = por %p1017_p10, %p1016_p2 }
  0x2e   : > { %p1019_p12 = pnand %p1018_p11, %p1012_p4 }
  0x30   : > { %1022 = shalt.err (!%p1019_p12)
}
  0x31   : > { %s1634_s14 = smov 128   ;;  %s1635_s6 = smov 8  }
  0x32   : > { %883 = dma.hbm_to_vmem [thread:$0]  (!%p1325_p5), %s1319_s8, 512, %s1321_s10, %s1331_s13, %s1634_s14, %s1634_s14, %s1635_s6  }
  0x33   : > { %p801_p2 = scmp.ge.s32.totalorder %s1209_s25, 1  ;;  %s224_s7 = scalar_lea.vmem [#allocation8], %s1329_s12 }
  0x34   : > { %s1364_s9 = sshll.u32 %s224_s7, 4  ;;  %p239_p4 = scmp.lt.s32.totalorder %s1209_s25, 5  ;;  %s1492_s9 = int_to_ptr.vmem [resolvable:$true] %s1364_s9 }
  0x35   : > { %s1372_s29 = sadd.s32 4294967295, %s1209_s25   ;;  %s790_s8 = sadd.s32 4294967294, %s1209_s25  }
  0x36   : > { %p1367_p9 = pnand %p801_p2, %p239_p4  ;;  %p33_p13 = scmp.ge.s32.totalorder %s32_s26, 2 }
  0x37   : > { %s35_s10 = sadd.s32 1, %s1205_s24  ;;  %s42_s12 = sadd.s32 1, %s1189_s20 }
  0x38   : > { %s1655_s28 = scalar_select %p1367_p9, 1, 0 }
  0x39   : > { %s1694_s26 = smov (%p33_p13, %s32_s26), 0  ;;  %s1696_s10 = smov (!%p33_p13, %s35_s10), %s1205_s24 }
  0x3a   : > { %1656 = sst [smem:[#allocation17_spill]] %s1694_s26  ;;  %p49_p1 = scmp.ne.s32.totalorder %s1189_s20, %s1185_s19 }
  0x3b   : > { %p55_p3 = scmp.ne.s32.totalorder %s1185_s19, %s1181_s18  ;;  %p37_p6 = scmp.ge.s32.totalorder %s1696_s10, 2 }
  0x3c   : > { %p56_p8 = scmp.eq.s32.totalorder %s1372_s29, 0  ;;  %p1394_p10 = por %p50_p0, %p49_p1 }
  0x3d   : > { %s65_s5 = ssub.s32 %s1201_s23, %s1694_s26  ;;  %s1698_s10 = smov (%p37_p6, %s1696_s10), 0 }
  0x3e   : > { %1658 = sst [smem:[#allocation18_spill]] %s1698_s10  ;;  %p1405_p11 = por %p56_p8, %p55_p3 }
  0x3f   : > { %p66_p12 = scmp.eq.s32.totalorder %s65_s5, 0  ;;  %s39_s14 = ssub.s32 %s1205_s24, %s1698_s10 }
  0x40   : > { %s1659_s7 = scalar_select %p1405_p11, 1, 0 }
  0x41   : > { %p1660_p2 = scmp.ne.s32.totalorder %s1173_s16, %s1169_s15  ;;  %p40_p0 = scmp.eq.s32.totalorder %s39_s14, 0 }
  0x42   : > { %p152_p13 = scmp.eq.s32.totalorder %s1372_s29, 3  ;;  %p158_p7 = scmp.eq.s32.totalorder %s790_s8, 3 }
  0x43   : > { %p1414_p4 = por %p1660_p2, %p56_p8  ;;  %s181_s5 = sand.u32 1, %s1189_s20  }
  0x44   : > { %s1422_s1 = scalar_select %p66_p12, %s1177_s17, %s68_s27  }
  0x45   : > { %s1661_s6 = scalar_select %p1414_p4, 1, 0 }
  0x46   : > { %1662 = sst [smem:[#allocation19_spill]] %s1422_s1  ;;  %p1430_p6 = por %p152_p13, %p49_p1 }
  0x47   : > { %s1425_s26 = scalar_select %p40_p0, %s1189_s20, %s42_s12  }
  0x48   : > { %s1664_s4 = scalar_select %p1430_p6, 1, 0 }
  0x49   : > { %1663 = sst [smem:[#allocation20_spill]] %s1425_s26  ;;  %s794_s15 = sshll.u32 %s1205_s24, 7 }
  0x4a   : > { %p1439_p8 = por %p158_p7, %p55_p3  ;;  %s793_s14 = sshll.u32 %s181_s5, 3 }
  0x4b   : > { %s1446_s27 = scalar_lea.hbm %s1628_s0, %s794_s15  ;;  %p1666_p12 = scmp.lt.s32.totalorder %s1209_s25, 4 }
  0x4c   : > { %s1665_s10 = scalar_select %p1439_p8, 1, 0 }
  0x4d   : > { %p1452_p1 = pnand %p1666_p12, %p1394_p10  ;;  %s185_s12 = scalar_lea.vmem [#allocation3], %s793_s14 }
  0x4e   : > { %s192_s24 = sshll.u32 %s185_s12, 4  ;;  %s819_s26 = sshll.u32 %s1201_s23, 8  ;;  %s1457_s24 = int_to_ptr.vmem [resolvable:$true] %s192_s24 }
  0x4f   : > { %s182_s3 = scalar_lea.sflag [#allocation4], %s181_s5  ;;  %s1023_s22 = scalar_lea.hbm %s1446_s27, 128 }
  0x50   : > { %p1024_p7 = scmp.ne.s32.totalorder %s1446_s27, %s1023_s22  ;;  %p1025_p3 = pneg %p1452_p1 }
  0x51   : > { %s1028_s20 = scalar_lea.hbm %s1628_s0, 256  ;;  %p1029_p10 = scmp.lt.u32.totalorder %s1446_s27, %s1628_s0 }
  0x52   : > { %p1026_p2 = pnand %p1025_p3, %p1024_p7  ;;  %p1030_p13 = scmp.lt.u32.totalorder %s1028_s20, %s1023_s22 }
  0x53   : > { %p1032_p8 = scmp.lt.u32.totalorder %s1023_s22, %s1446_s27 }
  0x54   : > { %p1027_p0 = pneg %p1026_p2  ;;  %p1031_p12 = por %p1030_p13, %p1029_p10 }
  0x56   : > { %p1033_p6 = por %p1032_p8, %p1031_p12 }
  0x58   : > { %p1034_p4 = pnand %p1033_p6, %p1027_p0 }
  0x5a   : > { %1037 = shalt.err (!%p1034_p4)
}
  0x5b   : > { %s1038_s5 = scalar_lea.vmem %s1457_s24, 128  ;;  %s1214_s14 = smov [#allocation3]  }
  0x5c   : > { %p1039_p7 = scmp.ne.s32.totalorder %s1457_s24, %s1038_s5  ;;  %s1043_s12 = sshll.u32 %s1214_s14, 4  ;;  %s1044_s12 = int_to_ptr.vmem [resolvable:$false] %s1043_s12 }
  0x5d   : > { %s1045_s1 = scalar_lea.vmem %s1044_s12, 256  ;;  %p1046_p9 = scmp.lt.s32.totalorder %s1457_s24, %s1044_s12 }
  0x5e   : > { %p1041_p2 = pnand %p1039_p7, %p1025_p3  ;;  %p1047_p10 = scmp.lt.s32.totalorder %s1045_s1, %s1038_s5 }
  0x60   : > { %p1042_p11 = pneg %p1041_p2  ;;  %p1048_p13 = por %p1047_p10, %p1046_p9 }
  0x62   : > { %p1049_p8 = pnand %p1048_p13, %p1042_p11 }
  0x64   : > { %1052 = shalt.err (!%p1049_p8)
}
  0x65   : > { %880 = dma.hbm_to_vmem [thread:$0]  (!%p1452_p1), %s1446_s27, 128, %s1457_s24, %s182_s3  }
  0x66   : > { %s1489_s22 = scalar_lea.hbm %s1630_s2, %s819_s26  ;;  %p1668_p11 = pneg %p1325_p5 }
  0x67   : > { %s1053_s30 = scalar_lea.hbm %s1489_s22, 256  ;;  %s1058_s27 = scalar_lea.hbm %s1630_s2, 512 }
  0x68   : > { %p1054_p9 = scmp.ne.s32.totalorder %s1489_s22, %s1053_s30  ;;  %p1059_p1 = scmp.lt.u32.totalorder %s1489_s22, %s1630_s2 }
  0x69   : > { %p1060_p3 = scmp.lt.u32.totalorder %s1058_s27, %s1053_s30  ;;  %p1062_p12 = scmp.lt.u32.totalorder %s1053_s30, %s1489_s22 }
  0x6a   : > { %p1056_p4 = pnand %p1054_p9, %p1668_p11 }
  0x6b   : > { %p1061_p0 = por %p1060_p3, %p1059_p1 }
  0x6c   : > { %p1057_p6 = pneg %p1056_p4 }
  0x6d   : > { %p1063_p7 = por %p1062_p12, %p1061_p0 }
  0x6f   : > { %p1064_p2 = pnand %p1063_p7, %p1057_p6 }
  0x71   : > { %1067 = shalt.err (!%p1064_p2)
}
  0x72   : > { %s1068_s26 = scalar_lea.vmem %s1492_s9, 256  ;;  %p1669_p13 = pmov %p1668_p11 }
  0x73   : > { %p1069_p10 = scmp.ne.s32.totalorder %s1492_s9, %s1068_s26  ;;  %s1215_s5 = smov [#allocation8]  }
  0x74   : > { %s1073_s14 = sshll.u32 %s1215_s5, 4  ;;  %s1074_s14 = int_to_ptr.vmem [resolvable:$false] %s1073_s14 }
  0x75   : > { %p1071_p8 = pnand %p1069_p10, %p1669_p13  ;;  %s1075_s12 = scalar_lea.vmem %s1074_s14, 512 }
  0x76   : > { %p1076_p11 = scmp.lt.s32.totalorder %s1492_s9, %s1074_s14  ;;  %p1077_p4 = scmp.lt.s32.totalorder %s1075_s12, %s1068_s26 }
  0x77   : > { %p1072_p9 = pneg %p1071_p8 }
  0x78   : > { %p1078_p1 = por %p1077_p4, %p1076_p11 }
  0x7a   : > { %p1079_p3 = pnand %p1078_p1, %p1072_p9 }
  0x7c   : > { %1082 = shalt.err (!%p1079_p3)
}
  0x7d   : > { %s1670_s1 = smov 8   ;;  %s1671_s17 = smov 128  }
  0x7e   : > { %886 = dma.hbm_to_vmem [thread:$0]  (!%p1325_p5), %s1489_s22, 256, %s1492_s9, %s1331_s13, %s1671_s17, %s1671_s17, %s1670_s1  }
  0x7f   : > { %p1672_p6 = scmp.ne.s32.totalorder %s1655_s28, 0 }
  0x80   : > { %s1524_s20 = sand.u32 (!%p1672_p6), 1, %s1185_s19   ;;  %p1673_p0 = scmp.ne.s32.totalorder (!%p1672_p6), %s1659_s7, 0 }
  0x81   : > { %243 = sbr.rel (%p1672_p6) target bundleno = 1329 (0x531), region = 36  ;;  %s802_s30 = sshll.u32 (!%p1672_p6), %s1524_s20, 3 }
  0x82   : > { %s246_s8 = scalar_lea.sflag (!%p1672_p6), [#allocation4], %s1524_s20  ;;  %s1528_s24 = scalar_lea.vmem (!%p1672_p6), [#allocation3], %s802_s30 }
  0x88   : > { %1156 = dma.done.wait (%p1673_p0), %s246_s8, 128  }
  0x89   : > { %1158 = vsyncadd (%p1673_p0), %s246_s8, 4294967168  ;;  %s254_s11 = sand.u32 1, %s1372_s29   ;;  %s256_s13 = sand.u32 1, %s1173_s16  }
  0x8a   : > { %s803_s9 = sshll.u32 %s256_s13, 5  ;;  %s255_s28 = scalar_lea.sflag [#allocation7], %s254_s11 }
  0x8b   : > { %s258_s22 = scalar_lea.vmem [#allocation6], %s803_s9  ;;  %p1674_p5 = scmp.ne.s32.totalorder %s1661_s6, 0 }
  0x8d   : > { %1160 = dma.done.wait (%p1674_p5), %s255_s28, 768  }
  0x8e   : > { %1162 = vsyncadd (%p1674_p5), %s255_s28, 4294966528  ;;  %s1540_s27 = sshll.u32 %s256_s13, 4  ;;  %s1543_s15 = scalar_lea.vmem [#allocation9], %s802_s30 }
  0x8f   : > { %s267_s3 = scalar_lea.vmem [#allocation8], %s1540_s27  ;;  %p806_p12 = scmp.ne.s32.totalorder %s1193_s21, 0 }
  0x90   : > { %vm306_vm0 = vcmask (!%p806_p12), 261120   ;;  %v1216_v0 = vmov (!%p806_p12), 0.0  }
  0x91   : > { %305 = sbr.rel (%p806_p12) target bundleno = 152 (0x98), region = 52  ;;  %307 = vst.msk [vmem:[#allocation2] sm:$0xff] (!%p806_p12), %vm306_vm0, %v1216_v0 }
  0x98 PF: > { %v309_v1 = vld [vmem:[%s258_s22] sm:$0xff]  ;;  %v310_v2 = vld [vmem:[%s258_s22 + $0x8] sm:$0xff]  ;;  %v311_v3 = vld [vmem:[%s258_s22 + $0x10] sm:$0xff]  ;;  %v1217_v4 = vmov 0.0|0.0   ;;  %vm1218_vm1 = vmmov 0   ;;  %v1219_v7 = vmov 0.0   ;;  %v387_v14 = vlaneseq }
  0x99   : > { %860 = vmatprep.subr.bf16.mxu0 %v1217_v4  ;;  %v861_v5 = vpack.c.bf16 %v310_v2, %v309_v1  ;;  %v312_v6 = vld [vmem:[%s258_s22 + $0x18] sm:$0xff]  ;;  %840 = vmatprep.mubr.msk.f32.mxu0 %vm1218_vm1, %v1219_v7  ;;  %vm313_vm2 = vcmask 261120   ;;  %s1220_s6 = smov 96   ;;  %s1221_s29 = smov 112   ;;  %vm395_vm3 = vcmask 130048   ;;  %vm471_vm5 = vcmask 64512  }
  0x9a   : > { %843 = vmatprep.subr.mxu1 %v1219_v7  ;;  %845 = vmatprep.mubr.msk.f32.mxu1 %vm1218_vm1, %v1219_v7  ;;  %v864_v8 = vpack.c.bf16 %v312_v6, %v311_v3  ;;  %v308_v9 = vld [vmem:[%s1528_s24] sm:$0xff]  ;;  %v388_v15 = vshrl.u32 %v387_v14, 7  ;;  %v390_v16 = vand.u32 127, %v387_v14  ;;  %v560_v26 = vld [vmem:[%s267_s3] sm:$0xff]  ;;  %v559_v34 = vld [vmem:[#allocation2] sm:$0xff]  ;;  %p812_p7 = scmp.ne.s32.totalorder %s1193_s21, 1 }
  0x9b   : > { %862 = vmatpush3.bf16.msra.mxu0 %v861_v5  ;;  %v561_v27 = vld [vmem:[%s267_s3 + $0x8] sm:$0xff]  ;;  %s1675_s5 = sld [smem:[#allocation22_spill]] (!%p812_p7) }
  0x9c   : > { %863 = vmatprep.subr.bf16.mxu0 %v1217_v4  ;;  %vm391_vm4 = vcmp.le.s32.totalorder %v390_v16, %v388_v15  ;;  %v867_v28 = vpack.c.bf16 %v561_v27, %v560_v26 }
  0x9f   : > { %865 = vmatpush3.bf16.msra.mxu0 %v864_v8 }
  0xa0   : > { %866 = vmatprep.subr.bf16.mxu0 %v1217_v4 }
  0xa1   : > { %v813_v39 = vld [vmem:[%s1675_s5] ss:$0 sm:$0xff] (!%p812_p7) }
  0xa2   : > { %841 = vmatmul.mubr.msk.f32.vlgmr.msra.gmra.mrb[0].mxu0 %vm313_vm2, %v308_v9 }
  0xa3   : > { %857 = vmatprep.mubr.msk.f32.mxu0 %vm1218_vm1, %v1219_v7  ;;  %868 = vmatpush3.bf16.msra.mxu0 %v867_v28 }
 0x175   : > { %v383_v10 = vpop.f32.mrb[0].mxu0 }
 0x176   : > { %482 = vrot.lane.b32.xlu1 %v383_v10, %s1220_s6  ;;  %393 = vrot.lane.b32.xlu0 %v383_v10, %s1221_s29  ;;  %v842_v11 = vpop.f32.mrb[1].mxu0 }
 0x1e8   : > { %v394_v12 = vpop.permute.xlu0 %393  ;;  %v483_v13 = vpop.permute.xlu1 %482 }
 0x1e9   : > { %844 = vmatpush3.xpose.msk.msra.mxu1 %vm395_vm3, %v394_v12 }
 0x1ea   : > { %848 = vmatprep.subr.mxu1 %v1219_v7 }
 0x1ec   : > { %846 = vmatmul.mubr.msk.f32.vlgmr.msra.gmra.mrb[0].mxu1 %vm395_vm3, %v383_v10 }
 0x1ed   : > { %849 = vmatpush3.msra.mxu1 %v483_v13  ;;  %850 = vmatprep.mubr.msk.f32.mxu1 %vm1218_vm1, %v1219_v7 }
 0x2bf   : > { %v466_v17 = vpop.f32.mrb[0].mxu1 }
 0x2c0   : > { %v470_v18 = vsel %vm391_vm4, %v466_v17, -inf  ;;  %v847_v19 = vpop.f32.mrb[1].mxu1 }
 0x2c1   : > { %v472_v20 = vsel %vm471_vm5, %v470_v18, -inf }
 0x2c2   : > { %473 = vmax.xlane.f32.xlu0 %v472_v20 }
 0x34f   : > { %v474_v21 = vpop.xlane.xlu0 %473 }
 0x350   : > { %v475_v22 = vsub.f32 %v470_v18, %v474_v21 }
 0x352   : > { %v476_v23 = vmul.f32 1.442695, %v475_v22 }
 0x354   : > { %989 = vpow2.f32 %v476_v23 }
 0x35e   : > { %v990_v24 = vpop.eup %989 }
 0x35f   : > { %851 = vmatmul.mubr.msk.f32.vlgmr.msra.gmra.mrb[2].mxu1 %vm471_vm5, %v990_v24  ;;  %v478_v25 = vsel %vm471_vm5, %v990_v24, 0.0 }
 0x360   : > { %479 = vadd.xlane.f32.xlu1 %v478_v25 }
 0x3ed   : > { %v480_v29 = vpop.xlane.xlu1 %479 }
 0x3ee   : > { %991 = vrcp.f32 %v480_v29 }
 0x3f8   : > { %v992_v30 = vpop.eup %991 }
 0x432   : > { %v554_v31 = vpop.f32.mrb[2].mxu1 }
 0x433   : > { %v558_v32 = vmul.f32 %v992_v30, %v554_v31  ;;  %v852_v33 = vpop.f32.mrb[3].mxu1 }
 0x435   : > { %858 = vmatmul.mubr.msk.f32.vlgmr.msra.gmra.mrb[2].mxu0 %vm395_vm3, %v558_v32 }
 0x505   : > { %640 = sbr.rel (%p812_p7) target bundleno = 1302 (0x516), region = 56 }
 0x508   : > { %v631_v35 = vpop.f32.mrb[2].mxu0 }
 0x509   : > { %v635_v36 = vadd.f32 %v631_v35, %v559_v34  ;;  %v859_v37 = vpop.f32.mrb[3].mxu0 }
 0x50b   : > { %636 = vst.msk [vmem:[#allocation2] sm:$0xff] %vm313_vm2, %v635_v36 }
 0x512   : > { %v641_v38 = vld [vmem:[#allocation2] sm:$0xff] }
 0x513   : > { %v649_v40 = vadd.f32 %v813_v39, %v641_v38 }
 0x515   : > { %650 = vst.msk [vmem:[%s1543_s15] sm:$0xff] %vm313_vm2, %v649_v40 }
 0x516 PF: > { %s1676_s14 = sld [smem:[#allocation15_spill]]  ;;  %s665_s8 = sshll.u32 %s1543_s15, 4  ;;  %s666_s8 = int_to_ptr.vmem [resolvable:$true] %s665_s8 }
 0x517   : > { %s1677_s30 = sld [smem:[#allocation23_spill]]  ;;  %s652_s24 = scalar_lea.sflag [#allocation5], %s1524_s20 }
 0x518   : > { %s1083_s11 = scalar_lea.vmem %s666_s8, 128  ;;  %p1678_p10 = scmp.ne.s32.totalorder %s1664_s4, 0 }
 0x519   : > { %p1084_p2 = scmp.ne.s32.totalorder %s666_s8, %s1083_s11  ;;  %s1222_s13 = smov [#allocation9]  }
 0x51a   : > { %s1087_s9 = sshll.u32 %s1222_s13, 4  ;;  %s1088_s9 = int_to_ptr.vmem [resolvable:$false] %s1087_s9 }
 0x51b   : > { %p1085_p13 = pnand %p1084_p2, %p1678_p10  ;;  %s1089_s28 = scalar_lea.vmem %s1088_s9, 256 }
 0x51c   : > { %s815_s12 = sshll.u32 %s1676_s14, 7  ;;  %p1090_p9 = scmp.lt.s32.totalorder %s666_s8, %s1088_s9 }
 0x51d   : > { %s1570_s21 = scalar_lea.hbm %s1677_s30, %s815_s12  ;;  %p1086_p8 = pneg %p1085_p13 }
 0x51e   : > { %p1091_p11 = scmp.lt.s32.totalorder %s1089_s28, %s1083_s11 }
 0x520   : > { %p1092_p4 = por %p1091_p11, %p1090_p9 }
 0x522   : > { %p1093_p1 = pnand %p1092_p4, %p1086_p8 }
 0x524   : > { %1096 = shalt.err (!%p1093_p1)
}
 0x525   : > { %s1097_s20 = scalar_lea.hbm %s1570_s21, 128  ;;  %s1101_s3 = scalar_lea.hbm %s1677_s30, 256 }
 0x526   : > { %p1098_p3 = scmp.ne.s32.totalorder %s1570_s21, %s1097_s20  ;;  %p1102_p5 = scmp.lt.u32.totalorder %s1570_s21, %s1677_s30 }
 0x527   : > { %p1103_p12 = scmp.lt.u32.totalorder %s1101_s3, %s1097_s20  ;;  %p1105_p2 = scmp.lt.u32.totalorder %s1097_s20, %s1570_s21 }
 0x528   : > { %p1099_p6 = pnand %p1098_p3, %p1678_p10 }
 0x529   : > { %p1104_p7 = por %p1103_p12, %p1102_p5 }
 0x52a   : > { %p1100_p0 = pneg %p1099_p6 }
 0x52b   : > { %p1106_p13 = por %p1105_p2, %p1104_p7 }
 0x52d   : > { %p1107_p8 = pnand %p1106_p13, %p1100_p0 }
 0x52f   : > { %1110 = shalt.err (!%p1107_p8)
}
 0x530   : > { %875 = dma.vmem_to_hbm [thread:$0]  (%p1678_p10), %s666_s8, 128, %s1570_s21, %s652_s24  }
 0x531 PF: > { %p892_p9 = scmp.ge.s32.totalorder %s1209_s25, 2  ;;  %s677_s29 = sand.u32 1, %s1181_s18  }
 0x532   : > { %p1679_p11 = scmp.ne.s32.totalorder %s1665_s10, 0  ;;  %s678_s7 = scalar_lea.sflag [#allocation5], %s677_s29 }
 0x534   : > { %p888_p4 = pnand %p892_p9, %p1679_p11 }
 0x536   : > { %1164 = dma.done.wait (!%p888_p4), %s678_s7, 128  }
 0x537   : > { %1166 = vsyncadd (!%p888_p4), %s678_s7, 4294967168  ;;  %s23_s25 = sadd.s32 1, %s1209_s25   ;;  %s1680_s26 = sld [smem:[#allocation13_spill]] }
 0x538   : > { %p20_p1 = scmp.ge.s32.totalorder %s23_s25, 6   ;;  %s1681_s17 = sld [smem:[#allocation19_spill]] }
 0x539   : > { %s1682_s4 = sld [smem:[#allocation14_spill]]  ;;  %s1683_s20 = sld [smem:[#allocation20_spill]] }
 0x53a   : > { %s1684_s22 = sld [smem:[#allocation16_spill]]  ;;  %s1685_s5 = sld [smem:[#allocation17_spill]] }
 0x53b   : > { %s1686_s24 = sld [smem:[#allocation18_spill]]  ;;  %s1687_s15 = smov %s1173_s16 }
 0x53c   : > { %s1689_s18 = smov %s1185_s19  ;;  %s1691_s21 = smov %s1201_s23 }
 0x53d   : > { %s1688_s16 = smov %s1680_s26  ;;  %22 = sbr.rel (!%p20_p1) target bundleno = 15 (0xf), region = 113 }
 0x53f   : > { %s1690_s19 = smov %s1682_s4 }
 0x540   : > { %s1692_s23 = smov %s1685_s5 }
 0x544   :  { %683 = vsyncpa [#allocation4], 1 }
 0x545   :  { %685 = vsyncpa [#allocation4 + $0x1], 1 }
 0x546   :  { %686 = vsyncpa [#allocation7], 1 }
 0x547   :  { %688 = vsyncpa [#allocation7 + $0x1], 1 }
 0x548   :  { %689 = vsyncpa [#allocation5], 1 }
 0x549   :  { %691 = vsyncpa [#allocation5 + $0x1], 1 }

</bundles_post_ra>
